<compile_context>
chip_gen: v6e
topology: v6e:2x2x1
jax: 0.10.0
libtpu: 0.0.40
codegen_flags: <defaults>
</compile_context>

<pallas_src>
import functools
import math

import jax
import jax.numpy as jnp
from jax import lax
from jax.experimental import pallas as pl
from jax.experimental.pallas import tpu as pltpu

CONSTANT_COEFFICIENT = -math.log(10000.0)


def _time_pos_enc_kernel(t_ref, out_ref, *, half, coeff):
    """One (tb, 1) tile of timesteps -> one (tb, emb_size) embedding tile."""
    emb_size = out_ref.shape[-1]
    # Lane index 0..emb_size-1; lanes [0, half) are the sin block, lanes
    # [half, emb) are the cos block of the same frequencies.
    lane = lax.broadcasted_iota(jnp.int32, (1, emb_size), 1)
    is_cos = lane >= half
    k = jnp.where(is_cos, lane - half, lane).astype(jnp.float32)
    freq = jnp.exp(jnp.float32(coeff) * k)                     # (1, emb)
    # (tb, 1) * (1, emb) -> (tb, emb); select sin/cos per lane.  Both
    # transcendentals run on the otherwise-idle EUP; one unmasked full-tile
    # store writes the whole embedding row.
    phase = t_ref[...] * freq
    out = jnp.where(is_cos, jnp.cos(phase), jnp.sin(phase))
    out_ref[...] = out.astype(out_ref.dtype)


def time_position_encoding(t, emb_size, *, block_b=1024, out_dtype=jnp.float32):
    """JAX wrapper reproducing TimePositionEncoding.forward(t).

    t: (B,) float array of timesteps.
    returns: (B, emb_size) array of dtype `out_dtype` (f32 by default).
    """
    assert emb_size % 2 == 0 and emb_size >= 4, "emb_size must be even and >= 4"
    half = emb_size // 2
    coeff = CONSTANT_COEFFICIENT / (half - 1)

    B = t.shape[0]
    # Row tile: multiple of 8 (sublane); capped both by block_b and so that a
    # double-buffered output tile stays around 4 MiB (safe vs. v7x's 32 MiB
    # scoped-VMEM default, with room for the tiny input tile).
    vmem_cap_rows = max(8, ((4 * 1024 * 1024) // (emb_size * 4)) // 8 * 8)
    tb = min(block_b, vmem_cap_rows, max(8, -(-B // 8) * 8))

    t2 = t.astype(jnp.float32).reshape(B, 1)

    kernel = functools.partial(_time_pos_enc_kernel, half=half, coeff=coeff)
    return pl.pallas_call(
        kernel,
        out_shape=jax.ShapeDtypeStruct((B, emb_size), out_dtype),
        grid=(pl.cdiv(B, tb),),                      # ragged last block is masked
        in_specs=[pl.BlockSpec((tb, 1), lambda i: (i, 0))],
        out_specs=pl.BlockSpec((tb, emb_size), lambda i: (i, 0)),
        compiler_params=pltpu.CompilerParams(
            dimension_semantics=("parallel",)),      # shards B across v7x's 2 TCs
    )(t2)


def _reference(t, emb_size):
    """Pure-JAX reference (mirrors the PyTorch forward)."""
    half = emb_size // 2
    emb = CONSTANT_COEFFICIENT / (half - 1)
    emb = jnp.exp(emb * jnp.arange(half, dtype=jnp.float32))
    emb = t.astype(jnp.float32)[:, None] * emb[None, :]
    return jnp.concatenate((jnp.sin(emb), jnp.cos(emb)), axis=-1)


if __name__ == "__main__":
    key = jax.random.PRNGKey(0)
    EMB_SIZE = 64  # half = 32

    # Deterministic example timesteps (e.g. diffusion timesteps in [0, 1000)).
    B = 8
    t = jax.random.uniform(key, (B,), dtype=jnp.float32) * 1000.0

    out = jax.block_until_ready(time_position_encoding(t, EMB_SIZE))
    ref = _reference(t, EMB_SIZE)
    assert out.shape == (B, EMB_SIZE), out.shape
    # Phases are computed identically; tolerance only covers possible
    # sin/cos argument-reduction differences at |phase| ~ 1e3.
    assert jnp.allclose(out, ref, atol=1e-4, rtol=1e-4), "mismatch vs reference"

    # Also exercise the B-not-multiple-of-8 (ragged last block) path.
    B2 = 5
    t2 = jax.random.uniform(jax.random.PRNGKey(1), (B2,), dtype=jnp.float32) * 1000.0
    out2 = jax.block_until_ready(time_position_encoding(t2, EMB_SIZE))
    ref2 = _reference(t2, EMB_SIZE)
    assert out2.shape == (B2, EMB_SIZE), out2.shape
    assert jnp.allclose(out2, ref2, atol=1e-4, rtol=1e-4), "mismatch (ragged batch)"

    print("KERNEL_OK")
</pallas_src>

<mosaic_0001>
module attributes {stable_mosaic.version = 11 : i64} {
  func.func @_time_pos_enc_kernel(%arg0: i32, %arg1: memref<8x1xf32, #tpu.memory_space<vmem>>, %arg2: memref<8x64xf32, #tpu.memory_space<vmem>>) attributes {dimension_semantics = [#tpu.dimension_semantics<parallel>], iteration_bounds = array<i64: 1>, scalar_prefetch = 0 : i64, scratch_operands = 0 : i64, tpu.core_type = #tpu.core_type<tc>, window_params = [{transform_indices = @transform_0, window_bounds = array<i64: 8, 1>}, {transform_indices = @transform_1, window_bounds = array<i64: 8, 64>}]} {
    %0 = tpu.iota {dimensions = array<i32: 1>} : vector<1x64xi32>
    %c32_i32 = arith.constant 32 : i32
    %1 = vector.broadcast %c32_i32 : i32 to vector<1x64xi32>
    %2 = arith.cmpi sge, %0, %1 : vector<1x64xi32>
    %c32_i32_0 = arith.constant 32 : i32
    %3 = vector.broadcast %c32_i32_0 : i32 to vector<1x64xi32>
    %4 = arith.subi %0, %3 : vector<1x64xi32>
    %5 = arith.select %2, %4, %0 : vector<1x64xi1>, vector<1x64xi32>
    %6 = arith.sitofp %5 : vector<1x64xi32> to vector<1x64xf32>
    %cst = arith.constant -0.297107756 : f32
    %7 = vector.broadcast %cst : f32 to vector<1x64xf32>
    %8 = arith.mulf %7, %6 : vector<1x64xf32>
    %9 = math.exp %8 : vector<1x64xf32>
    %c0 = arith.constant 0 : index
    %c0_1 = arith.constant 0 : index
    %10 = vector.load %arg1[%c0, %c0_1] : memref<8x1xf32, #tpu.memory_space<vmem>>, vector<8x1xf32>
    %11 = vector.broadcast %10 : vector<8x1xf32> to vector<8x64xf32>
    %12 = vector.broadcast %9 : vector<1x64xf32> to vector<8x64xf32>
    %13 = arith.mulf %11, %12 : vector<8x64xf32>
    %14 = math.cos %13 : vector<8x64xf32>
    %15 = math.sin %13 : vector<8x64xf32>
    %16 = vector.shape_cast %2 : vector<1x64xi1> to vector<1x64xi1>
    %17 = vector.broadcast %16 : vector<1x64xi1> to vector<8x64xi1>
    %18 = arith.select %17, %14, %15 : vector<8x64xi1>, vector<8x64xf32>
    %c0_2 = arith.constant 0 : index
    %c0_3 = arith.constant 0 : index
    %19 = vector.load %arg2[%c0_2, %c0_3] : memref<8x64xf32, #tpu.memory_space<vmem>>, vector<8x64xf32>
    tpu.vector_store %arg2[%c0_2, %c0_3], %18 {strides = array<i32>} : memref<8x64xf32, #tpu.memory_space<vmem>>, vector<8x64xf32>,
    return
  }
  func.func @transform_0(%arg0: i32) -> (i32, i32) {
    %c0_i32 = arith.constant 0 : i32
    %c0_i32_0 = arith.constant 0 : i32
    return %arg0, %c0_i32 : i32, i32
  }
  func.func @transform_1(%arg0: i32) -> (i32, i32) {
    %c0_i32 = arith.constant 0 : i32
    %c0_i32_0 = arith.constant 0 : i32
    return %arg0, %c0_i32 : i32, i32
  }
}

</mosaic_0001>

<bundles_post_ra>
// kernel: tpu_custom_call.1
= control target key start
LH: loop header
LB: loop body
LE: loop exit
PB: predicated region body
PF: predicated region fallthrough
CT: control target
= control target key end

     0   :  { %v301_v1 = vmov 0   ;;  %s355_s0 = inlined_call_operand.vmem [shape: f32[8,1], index: 0, kind: input, shape index: {}]   ;;  %s356_s1 = inlined_call_operand.hbm [shape: f32[8,64], index: 1, kind: output, shape index: {}]  }
   0x1   :  { %v18_v0 = vld [vmem:[%s355_s0] sm:$0xff]  ;;  %272 = vset.pattern.permute.xlu0 %v301_v1 }
   0x2   :  { %21 = vperm.xlu0 %272, %v18_v0  }
   0x3   :  { %6 = vsyncpa [#allocation3], 0  ;;  %v9_v2 = vlaneseq  ;;  %v302_v22 = vmov 683565275   ;;  %v303_v24 = vmov 2475754826  }
   0x4   :  { %v304_v27 = vmov 2131351028   ;;  %v305_v30 = vmov 2102212464   ;;  %v306_v33 = vmov 920167782  }
   0x5   :  { %v322_v3 = vand.u32 127, %v9_v2  ;;  %v307_v36 = vmov 1326507024   ;;  %s308_s0 = smov [#allocation2]  }
   0x6   :  { %s243_s8 = sshll.u32 %s308_s0, 4  ;;  %s244_s8 = int_to_ptr.vmem [resolvable:$true] %s243_s8 }
   0x7   :  { %v251_v4 = vadd.s32 4294967264, %v322_v3  ;;  %vm11_vm0 = vcmp.ge.s32.totalorder %v322_v3, 32  ;;  %s279_s9 = scalar_lea.vmem %s244_s8, 128  ;;  %p284_p1 = scmp.lt.s32.totalorder %s244_s8, %s244_s8 }
   0x8   :  { %p280_p0 = scmp.ne.s32.totalorder %s244_s8, %s279_s9  ;;  %p285_p2 = scmp.lt.s32.totalorder %s279_s9, %s279_s9 }
   0x9   :  { %v13_v5 = vsel %vm11_vm0, %v251_v4, %v322_v3 }
   0xa   :  { %v14_v6 = vcvt.s32.f32 %v13_v5  ;;  %p286_p3 = por %p285_p2, %p284_p1 }
   0xc   :  { %v15_v7 = vmul.f32 -0.29710776, %v14_v6  ;;  %p287_p4 = pnand %p286_p3, %p280_p0 }
   0xe   :  { %v16_v8 = vmul.f32 1.442695, %v15_v7 }
  0x10   :  { %273 = vpow2.f32 %v16_v8 }
  0x1d   :  { %v274_v9 = vpop.eup %273 }
  0x7d   :  { %v22_v10 = vpop.permute.xlu0 %21 }
  0x7e   :  { %v329_v11 = vmul.f32 %v274_v9, %v22_v10 }
  0x80   :  { %v28_v12 = vand.u32 2139095040, %v329_v11  ;;  %v25_v16 = vand.u32 2147483647, %v329_v11  ;;  %vm27_vm8 = vcmp.lt.s32.totalorder %v329_v11, 0 }
  0x82   :  { %v29_v13 = vshrl.u32 %v28_v12, 23  ;;  %v32_v19 = vand.u32 8388607, %v25_v16  ;;  %vm26_vm9 = vcmp.le.f32.partialorder %v25_v16, 0.7853982 }
  0x84   :  { %v252_v14 = vadd.s32 4294967169, %v29_v13  ;;  %v33_v38 = vor.u32 8388608, %v32_v19 }
  0x86   :  { %v35_v15 = vadd.s32 1, %v252_v14  ;;  %v73_v52 = vshll.u32 %v33_v38, 8 }
  0x88   :  { %vm36_vm1 = vcmp.gt.s32.totalorder %v35_v15, 0 }
  0x89   :  { %v37_v17 = vsel %vm36_vm1, %v35_v15, 0  ;;  %vm117_vm1 = vweird.f32 %v329_v11 }
  0x8a   :  { %v39_v18 = vand.u32 31, %v37_v17  ;;  %v38_v21 = vshrl.u32 %v37_v17, 5 }
  0x8c   :  { %v40_v20 = vsub.s32 32, %v39_v18  ;;  %v42_v23 = vshll.u32 %v302_v22, %v39_v18  ;;  %v45_v25 = vshll.u32 %v303_v24, %v39_v18  ;;  %v48_v29 = vshll.u32 %v304_v27, %v39_v18 }
  0x8d   :  { %v51_v32 = vshll.u32 %v305_v30, %v39_v18  ;;  %v54_v35 = vshll.u32 %v306_v33, %v39_v18  ;;  %vm57_vm2 = vcmp.lt.s32.totalorder %v38_v21, 1  ;;  %vm60_vm3 = vcmp.lt.s32.totalorder %v38_v21, 4 }
  0x8e   :  { %v43_v26 = vshrl.u32 %v303_v24, %v40_v20  ;;  %v46_v28 = vshrl.u32 %v304_v27, %v40_v20  ;;  %v49_v31 = vshrl.u32 %v305_v30, %v40_v20  ;;  %v52_v34 = vshrl.u32 %v306_v33, %v40_v20 }
  0x8f   :  { %v55_v37 = vshrl.u32 %v307_v36, %v40_v20  ;;  %v41_v47 = vshrl.u32 %v302_v22, %v40_v20  ;;  %vm59_vm4 = vcmp.lt.s32.totalorder %v38_v21, 3  ;;  %vm58_vm5 = vcmp.lt.s32.totalorder %v38_v21, 2 }
  0x90   :  { %v44_v39 = vor.u32 %v43_v26, %v42_v23  ;;  %v47_v40 = vor.u32 %v46_v28, %v45_v25  ;;  %v50_v41 = vor.u32 %v49_v31, %v48_v29  ;;  %v53_v42 = vor.u32 %v52_v34, %v51_v32 }
  0x91   :  { %v56_v43 = vor.u32 %v55_v37, %v54_v35 }
  0x92   :  { %v62_v44 = vsel %vm60_vm3, %v50_v41, 2102212464  ;;  %v65_v45 = vsel %vm57_vm2, %v44_v39, %v47_v40  ;;  %v69_v46 = vsel %vm57_vm2, %v47_v40, %v50_v41  ;;  %v66_v48 = vsel %vm60_vm3, %v53_v42, 920167782 }
  0x93   :  { %v70_v49 = vsel %vm60_vm3, %v56_v43, 1326507024  ;;  %v67_v50 = vsel %vm59_vm4, %v50_v41, %v66_v48  ;;  %v61_v53 = vsel %vm57_vm2, %v41_v47, %v44_v39  ;;  %v63_v54 = vsel %vm59_vm4, %v47_v40, %v62_v44 }
  0x94   :  { %v71_v51 = vsel %vm59_vm4, %v53_v42, %v70_v49  ;;  %v68_v55 = vsel %vm58_vm5, %v65_v45, %v67_v50  ;;  %v64_v61 = vsel %vm58_vm5, %v61_v53, %v63_v54  ;;  %vm235_vm2 = vcmask 523264  }
  0x95   :  { %v72_v56 = vsel %vm58_vm5, %v69_v46, %v71_v51  ;;  %v338_v59 = vmul.u32.u64.low %v73_v52, %v68_v55  ;;  %v339_v60 = vmul.u32.u64.high %v73_v52, %v68_v55, %v338_v59  ;;  %v80_v63 = vmul.u32 %v73_v52, %v64_v61 }
  0x96   :  { %v335_v57 = vmul.u32.u64.low %v73_v52, %v72_v56  ;;  %v336_v58 = vmul.u32.u64.high %v73_v52, %v72_v56, %v335_v57 }
  0x97   :  { %v83_v62 = vadd.s32 1, %v339_v60 }
  0x98   :  { %vm82_vm6 = vc.u32 %v336_v58, %v338_v59  ;;  %v81_v13 = vadd.s32 %v338_v59, %v336_v58 }
  0x99   :  { %v84_v0 = vsel %vm82_vm6, %v83_v62, %v339_v60 }
  0x9a   :  { %v85_v1 = vadd.s32 %v84_v0, %v80_v63 }
  0x9c   :  { %v86_v2 = vadd.s32 536870912, %v85_v1 }
  0x9e   :  { %v87_v4 = vshrl.u32 %v86_v2, 30 }
  0xa0   :  { %v88_v5 = vshll.u32 %v87_v4, 30  ;;  %v111_v27 = vsub.s32 4, %v87_v4 }
  0xa2   :  { %v89_v6 = vsub.s32 %v85_v1, %v88_v5  ;;  %v112_v30 = vsel %vm27_vm8, %v111_v27, %v87_v4 }
  0xa3   :  { %v114_v31 = vsel %vm26_vm9, 0, %v112_v30 }
  0xa4   :  { %v91_v7 = vsub.s32 0, %v89_v6  ;;  %v221_v32 = vadd.s32 3, %v114_v31  ;;  %v118_v33 = vand.u32 3, %v114_v31 }
  0xa6   :  { %v253_v8 = vmin.u32 %v91_v7, %v89_v6  ;;  %v222_v34 = vand.u32 3, %v221_v32  ;;  %vm123_vm10 = vcmp.eq.s32.totalorder %v118_v33, 2  ;;  %vm120_vm12 = vcmp.eq.s32.totalorder %v118_v33, 0 }
  0xa7   :  { %vm119_vm14 = vcmp.lt.s32.totalorder %v118_v33, 2 }
  0xa8   :  { %v93_v9 = vclz %v253_v8  ;;  %vm227_vm11 = vcmp.eq.s32.totalorder %v222_v34, 2  ;;  %vm224_vm13 = vcmp.eq.s32.totalorder %v222_v34, 0  ;;  %vm223_vm15 = vcmp.lt.s32.totalorder %v222_v34, 2 }
  0xaa   :  { %v254_v10 = vadd.s32 4294967294, %v93_v9 }
  0xac   :  { %vm255_vm7 = vcmp.lt.s32.totalorder %v254_v10, 0 }
  0xad   :  { %v96_v12 = vsel %vm255_vm7, 0, %v254_v10 }
  0xae   :  { %v97_v14 = vsub.s32 32, %v96_v12  ;;  %v101_v15 = vsub.s32 4294967266, %v96_v12  ;;  %v98_v17 = vshll.u32 %v89_v6, %v96_v12 }
  0xb0   :  { %v99_v18 = vshrl.u32 %v81_v13, %v97_v14  ;;  %v102_v19 = vadd.s32 127, %v101_v15 }
  0xb2   :  { %v100_v20 = vor.u32 %v99_v18, %v98_v17  ;;  %v103_v21 = vshll.u32 %v102_v19, 23 }
  0xb4   :  { %v104_v22 = vor.u32 4788187, %v103_v21  ;;  %v107_v24 = vcvt.s32.f32 %v100_v20 }
  0xb6   :  { %v105_v23 = vand.u32 2147483647, %v104_v22 }
  0xb8   :  { %v108_v25 = vmul.f32 %v107_v24, %v105_v23 }
  0xba   :  { %v109_v26 = vxor.u32 2147483648, %v108_v25 }
  0xbc   :  { %v110_v28 = vsel %vm27_vm8, %v109_v26, %v108_v25 }
  0xbd   :  { %v113_v29 = vsel %vm26_vm9, %v329_v11, %v110_v28 }
  0xbe   :  { %275 = vcosq.f32 %v113_v29 }
  0xbf   :  { %277 = vsinq.f32 %v113_v29 }
  0xcb   :  { %v276_v35 = vpop.eup %275 }
  0xcc   :  { %v278_v36 = vpop.eup %277  ;;  %v124_v37 = vxor.u32 2147483648, %v276_v35 }
  0xcd   :  { %v121_v38 = vxor.u32 2147483648, %v278_v36 }
  0xce   :  { %v125_v39 = vsel %vm123_vm10, %v124_v37, %v278_v36  ;;  %v229_v16 = vsel %vm227_vm11, %v124_v37, %v278_v36 }
  0xcf   :  { %v122_v40 = vsel %vm120_vm12, %v276_v35, %v121_v38  ;;  %v226_v41 = vsel %vm224_vm13, %v276_v35, %v121_v38 }
  0xd0   :  { %v126_v42 = vsel %vm119_vm14, %v122_v40, %v125_v39  ;;  %v230_v43 = vsel %vm223_vm15, %v226_v41, %v229_v16 }
  0xd1   :  { %v127_v44 = vsel %vm117_vm1, nan, %v126_v42  ;;  %v231_v45 = vsel %vm117_vm1, nan, %v230_v43 }
  0xd2   :  { %v234_v46 = vsel %vm11_vm0, %v127_v44, %v231_v45 }
  0xd3   :  { %236 = vst.msk [vmem:[#allocation2] sm:$0xff] %vm235_vm2, %v234_v46 }
  0xd4   :  { %290 = shalt.err (!%p287_p4)
}
  0xd5   :  { %246 = dma.vmem_to_hbm [thread:$0]  %s244_s8, 128, %s356_s1, [#allocation3]  }
  0xd6   :  { %299 = dma.done.wait [#allocation3], 128  }
  0xd7   :  { %300 = vsyncadd [#allocation3], 4294967168 }
  0xd8   :  { %250 = vsyncpa [#allocation3], 1 }

</bundles_post_ra>
